<compile_context>
chip_gen: v7x
topology: tpu7x:2x2x1
jax: 0.10.0
libtpu: 0.0.40
codegen_flags: <defaults>
</compile_context>

<pallas_src>
import jax
import jax.numpy as jnp
import numpy as np
from jax.experimental import pallas as pl
from jax.experimental.pallas import tpu as pltpu


def _concat_feature_kernel(x_ref, w_ref, b_ref, o_ref):
    # x_ref: [TB, C, HW] (f32 or bf16); w_ref: [C, N_pad] f32; b_ref: [1, N_pad] f32.
    x = x_ref[...].astype(jnp.float32)       # f32 reduce/accumulate (v5e-safe for bf16 streams)
    s = jnp.sum(x, axis=-1)                  # [TB, C]   (the 1/HW mean scale is folded into w)
    o_ref[...] = (jnp.dot(s, w_ref[...], preferred_element_type=jnp.float32)
                  + b_ref[...]).astype(o_ref.dtype)


def _round_up(v, m):
    return ((v + m - 1) // m) * m


def _vmem_limit_bytes():
    """3/4 of physical VMEM: ~48 MiB on v7x (64 MiB), ~96 MiB on v5e/v6e (128 MiB)."""
    capacity = 64 << 20                      # conservative fallback = v7x per-TC physical VMEM
    try:
        capacity = int(pltpu.get_tpu_info().vmem_capacity_bytes)
    except Exception:
        pass
    return (capacity * 3) // 4


def _pick_tiling(B, per_sample_bytes, x_budget_bytes):
    """Choose (tb, n_tiles, B_pad) for the batch grid axis.

    Tiny problems run as a single grid step.  Otherwise: aim for >= 4 tiles so
    HBM DMA overlaps compute, tb a multiple of 8 (never a ragged second-minor
    output dim), double-buffered x tiles within x_budget_bytes, per-tile size
    capped ~8 MiB (already on the HBM-roofline plateau), and an even tile
    count (balanced v7x two-TensorCore split) whenever it costs no padding.
    """
    max_tb = max(1, x_budget_bytes // (2 * per_sample_bytes))   # 2x: double-buffered x
    if B <= max_tb and (B * per_sample_bytes <= (4 << 20) or B < 32):
        return B, 1, B                                          # single grid step

    cap_tb = max(8, ((8 << 20) // per_sample_bytes) // 8 * 8)   # ~8 MiB per tile
    max_tb8 = max(8, min((max_tb // 8) * 8, cap_tb))
    tb = min(max_tb8, max(8, (pl.cdiv(B, 4) // 8) * 8))         # aim for >= 4 tiles
    n_tiles = pl.cdiv(B, tb)
    if n_tiles % 2:
        # Largest smaller multiple-of-8 tile giving an even tile count for free.
        for cand in range(tb - 8, 7, -8):
            if pl.cdiv(B, cand) % 2 == 0:
                tb, n_tiles = cand, pl.cdiv(B, cand)
                break
    # If batch zero-padding would exceed ~25% of B and a single tile fits, bail out.
    if (n_tiles * tb - B) * 4 > B and B <= max_tb:
        return B, 1, B
    return tb, n_tiles, n_tiles * tb


def _resident_spec(block_shape, index_map, single_buffer):
    """Grid-invariant operand (block (0,0) every step): single-buffer it."""
    if single_buffer:
        try:
            return pl.BlockSpec(block_shape, index_map, pipeline_mode=pl.Buffered(1))
        except TypeError:        # jax version without pipeline_mode on BlockSpec
            pass
    return pl.BlockSpec(block_shape, index_map)


def make_concat_feature_net(w_models, b_models, w_fc, b_fc, input_hw):
    """One-time setup (mirrors the module's dummy_input __init__ pass).

    Fuses  x -> GAP -> [proj_m] -> concat -> fc  into
           out = sum_hw(x) @ w_fused + b_fused,  w_fused = (w_cat @ w_fc) / HW.
    Returns a jitted forward(x) with x of shape [B, C, H, W] (f32 or bf16).
    """
    H, W = input_hw
    HW = H * W
    w_cat = jnp.concatenate(w_models, axis=1)                 # [C, F_total]
    b_cat = jnp.concatenate(b_models, axis=1)                 # [1, F_total]
    C = w_cat.shape[0]
    n_cls = w_fc.shape[1]
    n_pad = _round_up(n_cls, 128)                             # lane-dense output stores

    # Hoisted weight fusion: done once here, never in the per-call path.
    w_fused = (w_cat @ w_fc) / float(HW)                      # [C, n_cls], 1/HW folded in
    b_fused = b_cat @ w_fc + b_fc                             # [1, n_cls]
    if n_pad != n_cls:
        w_fused = jnp.pad(w_fused, ((0, 0), (0, n_pad - n_cls)))
        b_fused = jnp.pad(b_fused, ((0, 0), (0, n_pad - n_cls)))

    vmem_limit = _vmem_limit_bytes()
    # Resident footprint (single-buffered weight + bias) plus a reserve for the
    # double-buffered output tile and compiler scratch.
    resident = (_round_up(C, 8) * n_pad + 8 * n_pad) * 4 + (2 << 20)
    x_budget = max(1, int(0.8 * vmem_limit) - resident)

    def _build_forward(single_buffer_resident):
        def forward(x):
            B = x.shape[0]
            assert x.shape[1] == C and x.shape[2] * x.shape[3] == HW
            # NCHW -> [B, C, HW]; HW maps to lanes (HW=256 here is 128-aligned).
            # For backbones with HW % 128 != 0 (e.g. 7x7), a [B, HW, C] layout
            # with a sublane reduce would be lane-dense instead.
            x3 = x.reshape(B, C, HW)
            per_sample = (_round_up(C, 8) * _round_up(HW, 128)
                          * jnp.dtype(x.dtype).itemsize)      # (8,128)-padding aware
            tb, n_tiles, b_pad = _pick_tiling(B, per_sample, x_budget)
            if b_pad > B:
                x3 = jnp.pad(x3, ((0, b_pad - B), (0, 0), (0, 0)))
            out = pl.pallas_call(
                _concat_feature_kernel,
                out_shape=jax.ShapeDtypeStruct((b_pad, n_pad), jnp.float32),
                grid=(n_tiles,),
                in_specs=[
                    pl.BlockSpec((tb, C, HW), lambda i: (i, 0, 0)),    # streamed per tile
                    _resident_spec((C, n_pad), lambda i: (0, 0),
                                   single_buffer_resident),            # resident weight
                    _resident_spec((1, n_pad), lambda i: (0, 0),
                                   single_buffer_resident),            # resident bias
                ],
                out_specs=pl.BlockSpec((tb, n_pad), lambda i: (i, 0)),
                compiler_params=pltpu.CompilerParams(
                    dimension_semantics=("parallel",),   # megacore split on v7x
                    vmem_limit_bytes=int(vmem_limit),
                ),
            )(x3, w_fused, b_fused)
            return out[:B, :n_cls]
        return jax.jit(forward)

    fwd = _build_forward(True)
    try:   # verify Buffered(1) on the grid-invariant operands lowers; else fall back
        fwd.lower(jax.ShapeDtypeStruct((1, C, H, W), jnp.float32))
    except Exception:
        fwd = _build_forward(False)
    return fwd


def reference(x, w_models, b_models, w_fc, b_fc):
    B, C, H, W = x.shape
    gap = x.reshape(B, C, H * W).mean(axis=-1)
    feats = [gap @ w + b for w, b in zip(w_models, b_models)]
    ft_concat = jnp.concatenate(feats, axis=1)
    return ft_concat @ w_fc + b_fc


if __name__ == "__main__":
    # Small, deterministic shapes consistent with the module's forward.
    B, C, H, W = 2, 4, 16, 16
    model_feature_dims = (48, 80)        # per-"pretrained model" feature sizes
    F_TOTAL = sum(model_feature_dims)    # ft_concat_size = 128
    N_CLASSES = 101                      # nn.Linear(ft_concat_size, 101)

    key = jax.random.PRNGKey(0)
    keys = jax.random.split(key, 2 * len(model_feature_dims) + 3)

    x = jax.random.normal(keys[0], (B, C, H, W), dtype=jnp.float32)

    # Synthetic "pretrained model" heads: Linear(C, F_m) applied to GAP features.
    # TODO(synk): real pretrained backbones (e.g. AlexNet) have no in-script
    # equivalent; they are replaced by deterministic GAP+linear feature stubs.
    w_models, b_models = [], []
    for m, f_m in enumerate(model_feature_dims):
        bound = 1.0 / np.sqrt(C)
        w_models.append(jax.random.uniform(
            keys[1 + 2 * m], (C, f_m), jnp.float32, minval=-bound, maxval=bound))
        b_models.append(jax.random.uniform(
            keys[2 + 2 * m], (1, f_m), jnp.float32, minval=-bound, maxval=bound))

    # Final fc layer, nn.Linear default-style init.
    bound = 1.0 / np.sqrt(F_TOTAL)
    w_fc = jax.random.uniform(keys[-2], (F_TOTAL, N_CLASSES), jnp.float32,
                              minval=-bound, maxval=bound)
    b_fc = jax.random.uniform(keys[-1], (1, N_CLASSES), jnp.float32,
                              minval=-bound, maxval=bound)

    # One-time construction (hoisted weight fusion); per-step work is the kernel only.
    fwd = make_concat_feature_net(w_models, b_models, w_fc, b_fc, input_hw=(H, W))

    out = jax.block_until_ready(fwd(x))
    ref = reference(x, w_models, b_models, w_fc, b_fc)
    np.testing.assert_allclose(np.asarray(out), np.asarray(ref),
                               rtol=1e-3, atol=1e-3)
    assert out.shape == (B, N_CLASSES)

    # bf16-streaming path (halves HBM traffic; in-kernel accumulation stays f32).
    out_bf16 = jax.block_until_ready(fwd(x.astype(jnp.bfloat16)))
    np.testing.assert_allclose(np.asarray(out_bf16), np.asarray(ref),
                               rtol=2e-2, atol=2e-2)

    print("KERNEL_OK")
</pallas_src>

<mosaic_0001>
module attributes {stable_mosaic.version = 11 : i64} {
  func.func @_concat_feature_kernel(%arg0: i32, %arg1: memref<2x4x256xf32, #tpu.memory_space<vmem>>, %arg2: memref<4x128xf32, #tpu.memory_space<vmem>>, %arg3: memref<1x128xf32, #tpu.memory_space<vmem>>, %arg4: memref<2x128xf32, #tpu.memory_space<vmem>>) attributes {dimension_semantics = [#tpu.dimension_semantics<parallel>], iteration_bounds = array<i64: 1>, scalar_prefetch = 0 : i64, scratch_operands = 0 : i64, tpu.core_type = #tpu.core_type<tc>, window_params = [{transform_indices = @transform_0, window_bounds = array<i64: 2, 4, 256>}, {pipeline_mode = #tpu.pipeline_mode<synchronous>, transform_indices = @transform_1, window_bounds = array<i64: 4, 128>}, {pipeline_mode = #tpu.pipeline_mode<synchronous>, transform_indices = @transform_2, window_bounds = array<i64: 1, 128>}, {transform_indices = @transform_3, window_bounds = array<i64: 2, 128>}]} {
    %c0 = arith.constant 0 : index
    %c0_0 = arith.constant 0 : index
    %c0_1 = arith.constant 0 : index
    %0 = vector.load %arg1[%c0, %c0_0, %c0_1] : memref<2x4x256xf32, #tpu.memory_space<vmem>>, vector<2x4x256xf32>
    %cst = arith.constant dense<0.000000e+00> : vector<2x4xf32>
    %1 = vector.multi_reduction <add>, %0, %cst [2] : vector<2x4x256xf32> to vector<2x4xf32>
    %c0_2 = arith.constant 0 : index
    %c0_3 = arith.constant 0 : index
    %2 = vector.load %arg2[%c0_2, %c0_3] : memref<4x128xf32, #tpu.memory_space<vmem>>, vector<4x128xf32>
    %cst_4 = arith.constant dense<0.000000e+00> : vector<2x128xf32>
    %3 = tpu.matmul %1, %2, %cst_4 {dimension_numbers = #tpu.dot_dimension_numbers<[1], [0], [0], [1], [0, 0, 1, 1], [], []>} : vector<2x4xf32>, vector<4x128xf32>, vector<2x128xf32> -> vector<2x128xf32>
    %c0_5 = arith.constant 0 : index
    %c0_6 = arith.constant 0 : index
    %4 = vector.load %arg3[%c0_5, %c0_6] : memref<1x128xf32, #tpu.memory_space<vmem>>, vector<1x128xf32>
    %5 = vector.broadcast %4 : vector<1x128xf32> to vector<2x128xf32>
    %6 = arith.addf %3, %5 : vector<2x128xf32>
    %c0_7 = arith.constant 0 : index
    %c0_8 = arith.constant 0 : index
    %7 = vector.load %arg4[%c0_7, %c0_8] : memref<2x128xf32, #tpu.memory_space<vmem>>, vector<2x128xf32>
    tpu.vector_store %arg4[%c0_7, %c0_8], %6 {strides = array<i32>} : memref<2x128xf32, #tpu.memory_space<vmem>>, vector<2x128xf32>,
    return
  }
  func.func @transform_0(%arg0: i32) -> (i32, i32, i32) {
    %c0_i32 = arith.constant 0 : i32
    %c0_i32_0 = arith.constant 0 : i32
    %c0_i32_1 = arith.constant 0 : i32
    return %arg0, %c0_i32, %c0_i32_0 : i32, i32, i32
  }
  func.func @transform_1(%arg0: i32) -> (i32, i32) {
    %c0_i32 = arith.constant 0 : i32
    %c0_i32_0 = arith.constant 0 : i32
    %c0_i32_1 = arith.constant 0 : i32
    return %c0_i32, %c0_i32_0 : i32, i32
  }
  func.func @transform_2(%arg0: i32) -> (i32, i32) {
    %c0_i32 = arith.constant 0 : i32
    %c0_i32_0 = arith.constant 0 : i32
    %c0_i32_1 = arith.constant 0 : i32
    return %c0_i32, %c0_i32_0 : i32, i32
  }
  func.func @transform_3(%arg0: i32) -> (i32, i32) {
    %c0_i32 = arith.constant 0 : i32
    %c0_i32_0 = arith.constant 0 : i32
    return %arg0, %c0_i32 : i32, i32
  }
}

</mosaic_0001>

<bundles_post_ra>
// kernel: forward.1
= control target key start
LH: loop header
LB: loop body
LE: loop exit
PB: predicated region body
PF: predicated region fallthrough
CT: control target
= control target key end

     0   :  { %vm23_vm0 = vcmask 1043456   ;;  %s238_s0 = inlined_call_operand.vmem [shape: f32[2,4,256], index: 0, kind: input, shape index: {}]   ;;  %s239_s1 = inlined_call_operand.vmem [shape: f32[4,128], index: 1, kind: input, shape index: {}]   ;;  %s240_s2 = inlined_call_operand.vmem [shape: f32[1,128], index: 2, kind: input, shape index: {}]   ;;  %s241_s3 = inlined_call_operand.hbm [shape: f32[2,128], index: 3, kind: output, shape index: {}]  }
   0x1   :  { %v15_v0 = vld [vmem:[%s238_s0] sm:$0xff]  ;;  %v16_v1 = vld [vmem:[%s238_s0 + $0x8] sm:$0xff] }
   0x2   :  { %8 = vsyncpa [#allocation3], 0  ;;  %v19_v2 = vcombine.high %v15_v0, %v15_v0  ;;  %v24_v3 = vsel %vm23_vm0, %v15_v0, 0.0  ;;  %v20_v4 = vcombine.high %v16_v1, %v16_v1  ;;  %v29_v6 = vsel %vm23_vm0, %v16_v1, 0.0  ;;  %v34_v10 = vld [vmem:[%s239_s1] sm:$0xf] }
   0x3   :  { %v186_v11 = vmov 0.0   ;;  %vm187_vm1 = vmmov 0   ;;  %v44_v12 = vlaneseq  ;;  %vm54_vm2 = vcmask 1041409   ;;  %v147_v21 = vld [vmem:[%s240_s2] ss:$0 sm:$0xff]  ;;  %s188_s18 = smov [#allocation2]  }
   0x4   :  { %v25_v5 = vsel %vm23_vm0, %v19_v2, 0.0  ;;  %v30_v7 = vsel %vm23_vm0, %v20_v4, 0.0  ;;  %152 = vmatprep.subr.mxu0 %v186_v11  ;;  %154 = vmatprep.mubr.msk.f32.mxu0 %vm187_vm1, %v186_v11  ;;  %vm56_vm3 = vcmask 31744   ;;  %s139_s19 = sshll.u32 %s188_s18, 4  ;;  %s140_s19 = int_to_ptr.vmem [resolvable:$true] %s139_s19 }
   0x5   :  { %v26_v8 = vadd.f32 %v25_v5, %v24_v3  ;;  %v31_v9 = vadd.f32 %v30_v7, %v29_v6  ;;  %153 = vmatpush3.msk.msra.mxu0 %vm23_vm0, %v34_v10  ;;  %v45_v13 = vand.u32 127, %v44_v12  ;;  %v47_v14 = vshrl.u32 %v44_v12, 7  ;;  %s162_s20 = scalar_lea.vmem %s140_s19, 32  ;;  %p167_p1 = scmp.lt.s32.totalorder %s140_s19, %s140_s19 }
   0x6   :  { %p163_p0 = scmp.ne.s32.totalorder %s140_s19, %s162_s20  ;;  %p168_p2 = scmp.lt.s32.totalorder %s162_s20, %s162_s20 }
   0x7   :  { %27 = vadd.xlane.f32.xlu0 %v26_v8  ;;  %v48_v16 = vsub.s32 %v45_v13, %v47_v14 }
   0x8   :  { %p169_p3 = por %p168_p2, %p167_p1 }
   0xa   :  { %p170_p4 = pnand %p169_p3, %p163_p0 }
   0xb   :  { %32 = vadd.xlane.f32.xlu0 %v31_v9 }
  0x94   :  { %v28_v15 = vpop.xlane.xlu0 %27 }
  0x95   :  { %v49_v18 = vrot.slane %v28_v15, %v48_v16 }
  0x98   :  { %v33_v17 = vpop.xlane.xlu0 %32 }
  0x99   :  { %v53_v19 = vrot.slane %v33_v17, %v48_v16 }
  0x9b   :  { %v55_v20 = vsel %vm54_vm2, %v53_v19, %v49_v18 }
  0x9c   :  { %155 = vmatmul.mubr.msk.f32.vlgmr.msra.gmra.mrb[0].mxu0 %vm56_vm3, %v55_v20 }
 0x16f   :  { %v128_v22 = vpop.f32.mrb[0].mxu0 }
 0x170   :  { %v129_v23 = vadd.f32 %v147_v21, %v128_v22  ;;  %v156_v24 = vpop.f32.mrb[1].mxu0 }
 0x172   :  { %132 = vst [vmem:[#allocation2] sm:$0x3] %v129_v23 }
 0x173   :  { %173 = shalt.err (!%p170_p4)
}
 0x174   :  { %s174_s23 = scalar_lea.hbm %s241_s3, 32 }
 0x175   :  { %p175_p5 = scmp.ne.s32.totalorder %s241_s3, %s174_s23  ;;  %p178_p6 = scmp.lt.u32.totalorder %s174_s23, %s241_s3 }
 0x177   :  { %p180_p7 = pnand %p178_p6, %p175_p5 }
 0x179   :  { %183 = shalt.err (!%p180_p7)
}
 0x17a   :  { %142 = dma.vmem_to_hbm [thread:$0]  %s140_s19, 32, %s241_s3, [#allocation3]  }
 0x17b   :  { %184 = dma.done.wait [#allocation3], 32  }
 0x17c   :  { %185 = vsyncadd [#allocation3], 4294967264 }
 0x17d   :  { %146 = vsyncpa [#allocation3], 1 }

</bundles_post_ra>
